<compile_context>
chip_gen: v7x
topology: tpu7x:2x2x1
jax: 0.10.0
libtpu: 0.0.40
codegen_flags: <defaults>
</compile_context>

<pallas_src>
import jax
import jax.numpy as jnp
from jax.experimental import pallas as pl
from jax.experimental.pallas import tpu as pltpu


# ----------------------------------------------------------------------------
# Kernel
# ----------------------------------------------------------------------------
def _mg_mc_kernel(u_ref, i_ref, w1u_ref, w1i_ref, w2_ref, w3_ref,
                  b_ref, b4_ref, out_ref):
    f32, bf16 = jnp.float32, jnp.bfloat16

    # raw (unpadded) embeddings; bf16 cast happens in VMEM (cheap VPU work)
    u = u_ref[...].astype(bf16)                       # (TB, D)
    i = i_ref[...].astype(bf16)                       # (TB, D)

    # layer 1 of both towers (BN folded into weights/bias).
    # concat(u, i) @ W1 expressed as a sum of two matmuls -> no lane shuffle.
    h = (jnp.dot(u, w1u_ref[...], preferred_element_type=f32) +
         jnp.dot(i, w1i_ref[...], preferred_element_type=f32))
    h = jnp.maximum(h + b_ref[0:1, :], 0.0)           # (TB, Dp) f32

    # layer 2 of both towers: one block-diagonal 128-wide matmul.
    # Result lanes [0,2D) == cat(x_u, x_i); padded lanes stay exactly zero.
    h = jnp.dot(h.astype(bf16), w2_ref[...], preferred_element_type=f32)
    h = h + b_ref[1:2, :]

    # fusion head: ui_layer1 (+ folded ui_bn), ReLU.
    h = jnp.dot(h.astype(bf16), w3_ref[...], preferred_element_type=f32)
    h = jnp.maximum(h + b_ref[2:3, :], 0.0)

    # final [D,1] linear: VPU multiply + cross-lane reduce, scalar bias (SMEM).
    scores = jnp.sum(h * b_ref[3:4, :], axis=-1) + b4_ref[0, 0]     # (TB,)
    out_ref[...] = scores.reshape(out_ref.shape).astype(out_ref.dtype)


# ----------------------------------------------------------------------------
# Wrapper
# ----------------------------------------------------------------------------
def _round_up(x, m):
    return ((x + m - 1) // m) * m


def mg_mc_forward(u_embed, i_embed, params, *, tile_b=4096, eps=1e-5):
    """Fused MG_MC forward (eval mode).  Returns scores of shape [B]."""
    B, D = u_embed.shape
    assert i_embed.shape == (B, D)
    f32, bf16 = jnp.float32, jnp.bfloat16

    # one 128-lane feature group holds both towers: u -> [0,D), i -> [D,2D)
    Dp = max(128, _round_up(2 * D, 128))

    # ---- batch tiling -------------------------------------------------------
    tile_b = int(min(tile_b, B))
    if tile_b < B:
        tile_b = max(8, (tile_b // 8) * 8)
    n_tiles = pl.cdiv(B, tile_b)
    # Prefer >= 2 grid tiles for large batches so the "parallel" axis can
    # shard across both v7x TensorCores (megacore).
    if n_tiles == 1 and B >= 1024:
        tile_b = _round_up(pl.cdiv(B, 2), 8)
        n_tiles = pl.cdiv(B, tile_b)

    # ---- fold BatchNorm into the preceding Linear ---------------------------
    def fold_bn(lin, bnp):
        w, b = lin                                   # torch layout: w is [out,in]
        gamma, beta, mean, var = bnp
        scale = gamma / jnp.sqrt(var + eps)
        return w.T * scale[None, :], b * scale + (beta - mean * scale)

    wu1_t, bu1 = fold_bn(params["u_layer1"], params["u_bn"])        # (D,D),(D,)
    wi1_t, bi1 = fold_bn(params["i_layer1"], params["i_bn"])        # (D,D),(D,)
    wui1_t, bui1 = fold_bn(params["ui_layer1"], params["ui_bn"])    # (2D,D),(D,)

    def lane_pad(v):
        return jnp.zeros((Dp,), f32).at[: v.shape[0]].set(v.astype(f32))

    # layer 1: u features -> lanes [0,D), i features -> lanes [D,2D)
    w1u = jnp.zeros((D, Dp), f32).at[:, :D].set(wu1_t)
    w1i = jnp.zeros((D, Dp), f32).at[:, D:2 * D].set(wi1_t)

    # layer 2: block-diagonal inside the single 128-lane group
    w2 = (jnp.zeros((Dp, Dp), f32)
          .at[:D, :D].set(params["u_layer2"][0].T)
          .at[D:2 * D, D:2 * D].set(params["i_layer2"][0].T))

    # fusion layer (ui_layer1 + ui_bn folded): rows [0,2D) -> lanes [0,D)
    w3 = jnp.zeros((Dp, Dp), f32).at[:2 * D, :D].set(wui1_t)

    # packed per-feature vectors: [b1 | b2 | b3 | head_row]  (one tiny f32 DMA)
    b_pack = jnp.stack([
        lane_pad(jnp.concatenate([bu1, bi1])),
        lane_pad(jnp.concatenate([params["u_layer2"][1], params["i_layer2"][1]])),
        lane_pad(bui1),
        lane_pad(params["ui_layer2"][0][0]),
    ])                                                              # (4, Dp)
    b4 = params["ui_layer2"][1].reshape(1, 1).astype(f32)           # SMEM scalar

    # bf16 weights: 2x MXU rate, half the weight bytes; f32 accumulation.
    w1u, w1i, w2, w3 = (w.astype(bf16) for w in (w1u, w1i, w2, w3))

    # ---- output layout: lane-dense full-vreg blocks when possible -----------
    if tile_b % 128 == 0:
        rows = tile_b // 128
        out_block, out_shape = (1, rows, 128), (n_tiles, rows, 128)
    else:
        out_block, out_shape = (1, 1, tile_b), (n_tiles, 1, tile_b)

    # ---- cost / VMEM sizing --------------------------------------------------
    weight_bytes = ((w1u.size + w1i.size + w2.size + w3.size) * 2
                    + b_pack.size * 4 + 4)
    in_item = u_embed.dtype.itemsize
    flops = 2 * n_tiles * tile_b * (2 * D * Dp + 2 * Dp * Dp + Dp)
    cost = pl.CostEstimate(flops=int(flops), transcendentals=0,
                           bytes_accessed=int(2 * B * D * in_item + B * 4
                                              + weight_bytes))

    in_vmem = 2 * 2 * tile_b * D * in_item      # u,i double-buffered
    out_vmem = 2 * tile_b * 4
    act_vmem = 4 * tile_b * Dp * 4              # f32/bf16 intermediates (generous)
    vmem_limit = int(min(32 * 2 ** 20,          # v7x-safe cap
                         max(16 * 2 ** 20,
                             2 * (in_vmem + out_vmem + 2 * weight_bytes + act_vmem))))

    # ---- specs ---------------------------------------------------------------
    row_spec = pl.BlockSpec((tile_b, D), lambda b: (b, 0))   # raw, unpadded rows

    def whole(arr):
        return pl.BlockSpec(arr.shape, lambda b, _n=arr.ndim: (0,) * _n)

    out = pl.pallas_call(
        _mg_mc_kernel,
        grid=(n_tiles,),
        in_specs=[
            row_spec, row_spec,                               # u, i batch tiles
            whole(w1u), whole(w1i),                           # layer-1 (BN folded)
            whole(w2), whole(w3),                             # layer-2 / fusion
            whole(b_pack),                                    # packed bias/head rows
            pl.BlockSpec(memory_space=pltpu.MemorySpace.SMEM),  # scalar out bias
        ],
        out_specs=pl.BlockSpec(out_block, lambda b: (b, 0, 0)),
        out_shape=jax.ShapeDtypeStruct(out_shape, jnp.float32),
        compiler_params=pltpu.CompilerParams(
            dimension_semantics=("parallel",),
            vmem_limit_bytes=vmem_limit,
        ),
        cost_estimate=cost,
    )(u_embed, i_embed, w1u, w1i, w2, w3, b_pack, b4)

    return out.reshape(-1)[:B]


# ----------------------------------------------------------------------------
# Plain-JAX reference (mirrors the PyTorch eval-mode forward), params, demo
# ----------------------------------------------------------------------------
def _reference_forward(u_embed, i_embed, params, eps=1e-5):
    def lin(x, w, b):
        return x @ w.T + b

    def bn(x, gamma, beta, mean, var):
        return (x - mean) / jnp.sqrt(var + eps) * gamma + beta

    x_u = jax.nn.relu(bn(lin(u_embed, *params["u_layer1"]), *params["u_bn"]))
    x_u = lin(x_u, *params["u_layer2"])
    x_i = jax.nn.relu(bn(lin(i_embed, *params["i_layer1"]), *params["i_bn"]))
    x_i = lin(x_i, *params["i_layer2"])
    x_ui = jnp.concatenate([x_u, x_i], axis=1)
    x = jax.nn.relu(bn(lin(x_ui, *params["ui_layer1"]), *params["ui_bn"]))
    return lin(x, *params["ui_layer2"])[:, 0]


def _init_params(key, D):
    ks = list(jax.random.split(key, 24))
    k = iter(ks)

    def linear(kw, kb, out_dim, in_dim):
        bound = 1.0 / jnp.sqrt(in_dim)
        w = jax.random.uniform(kw, (out_dim, in_dim), jnp.float32, -bound, bound)
        b = jax.random.uniform(kb, (out_dim,), jnp.float32, -bound, bound)
        return (w, b)

    def bn(kg, kb, dim):
        gamma = 1.0 + 0.1 * jax.random.normal(kg, (dim,), jnp.float32)
        beta = 0.1 * jax.random.normal(kb, (dim,), jnp.float32)
        mean = 0.05 * jax.random.normal(jax.random.fold_in(kg, 1), (dim,), jnp.float32)
        var = jnp.abs(1.0 + 0.1 * jax.random.normal(jax.random.fold_in(kb, 1),
                                                    (dim,), jnp.float32))
        return (gamma, beta, mean, var)

    return {
        "u_layer1": linear(next(k), next(k), D, D),
        "u_layer2": linear(next(k), next(k), D, D),
        "i_layer1": linear(next(k), next(k), D, D),
        "i_layer2": linear(next(k), next(k), D, D),
        "ui_layer1": linear(next(k), next(k), D, 2 * D),
        "ui_layer2": linear(next(k), next(k), 1, D),
        "u_bn": bn(next(k), next(k), D),
        "i_bn": bn(next(k), next(k), D),
        "ui_bn": bn(next(k), next(k), D),
    }


if __name__ == "__main__":
    key = jax.random.PRNGKey(0)
    k_u, k_i, k_p = jax.random.split(key, 3)

    B, D = 32, 32   # batch, embed_dim (small demo shapes)
    u_embed = jax.random.normal(k_u, (B, D), jnp.float32)
    i_embed = jax.random.normal(k_i, (B, D), jnp.float32)
    params = _init_params(k_p, D)

    ref = _reference_forward(u_embed, i_embed, params)

    # multi-tile path (grid of 2) and default single-tile path
    scores_tiled = jax.block_until_ready(
        mg_mc_forward(u_embed, i_embed, params, tile_b=16))
    scores_default = jax.block_until_ready(
        mg_mc_forward(u_embed, i_embed, params))

    assert scores_tiled.shape == (B,), scores_tiled.shape
    assert scores_default.shape == (B,), scores_default.shape
    # bf16 matmul inputs/weights with f32 accumulation -> loosened tolerance
    assert jnp.allclose(scores_tiled, ref, atol=5e-2, rtol=5e-2), (scores_tiled, ref)
    assert jnp.allclose(scores_default, ref, atol=5e-2, rtol=5e-2), (scores_default, ref)
    print("KERNEL_OK")
</pallas_src>

<mosaic_0001>
module attributes {stable_mosaic.version = 11 : i64} {
  func.func @_mg_mc_kernel(%arg0: i32, %arg1: memref<16x32xf32, #tpu.memory_space<vmem>>, %arg2: memref<16x32xf32, #tpu.memory_space<vmem>>, %arg3: memref<32x128xbf16, #tpu.memory_space<vmem>>, %arg4: memref<32x128xbf16, #tpu.memory_space<vmem>>, %arg5: memref<128x128xbf16, #tpu.memory_space<vmem>>, %arg6: memref<128x128xbf16, #tpu.memory_space<vmem>>, %arg7: memref<4x128xf32, #tpu.memory_space<vmem>>, %arg8: memref<1x1xf32, #tpu.memory_space<smem>>, %arg9: memref<1x1x16xf32, #tpu.memory_space<vmem>>) attributes {dimension_semantics = [#tpu.dimension_semantics<parallel>], iteration_bounds = array<i64: 2>, scalar_prefetch = 0 : i64, scratch_operands = 0 : i64, tpu.core_type = #tpu.core_type<tc>, window_params = [{transform_indices = @transform_0, window_bounds = array<i64: 16, 32>}, {transform_indices = @transform_1, window_bounds = array<i64: 16, 32>}, {pipeline_mode = #tpu.pipeline_mode<synchronous>, transform_indices = @transform_2, window_bounds = array<i64: 32, 128>}, {pipeline_mode = #tpu.pipeline_mode<synchronous>, transform_indices = @transform_3, window_bounds = array<i64: 32, 128>}, {pipeline_mode = #tpu.pipeline_mode<synchronous>, transform_indices = @transform_4, window_bounds = array<i64: 128, 128>}, {pipeline_mode = #tpu.pipeline_mode<synchronous>, transform_indices = @transform_5, window_bounds = array<i64: 128, 128>}, {pipeline_mode = #tpu.pipeline_mode<synchronous>, transform_indices = @transform_6, window_bounds = array<i64: 4, 128>}, {transform_indices = @transform_7, window_bounds = array<i64: 1, 1>}, {transform_indices = @transform_8, window_bounds = array<i64: 1, 1, 16>}]} {
    %c0 = arith.constant 0 : index
    %c0_0 = arith.constant 0 : index
    %0 = vector.load %arg1[%c0, %c0_0] : memref<16x32xf32, #tpu.memory_space<vmem>>, vector<16x32xf32>
    %1 = arith.truncf %0 : vector<16x32xf32> to vector<16x32xbf16>
    %c0_1 = arith.constant 0 : index
    %c0_2 = arith.constant 0 : index
    %2 = vector.load %arg2[%c0_1, %c0_2] : memref<16x32xf32, #tpu.memory_space<vmem>>, vector<16x32xf32>
    %3 = arith.truncf %2 : vector<16x32xf32> to vector<16x32xbf16>
    %c0_3 = arith.constant 0 : index
    %c0_4 = arith.constant 0 : index
    %4 = vector.load %arg3[%c0_3, %c0_4] : memref<32x128xbf16, #tpu.memory_space<vmem>>, vector<32x128xbf16>
    %cst = arith.constant dense<0.000000e+00> : vector<16x128xf32>
    %5 = tpu.matmul %1, %4, %cst {dimension_numbers = #tpu.dot_dimension_numbers<[1], [0], [0], [1], [0, 0, 1, 1], [], []>} : vector<16x32xbf16>, vector<32x128xbf16>, vector<16x128xf32> -> vector<16x128xf32>
    %c0_5 = arith.constant 0 : index
    %c0_6 = arith.constant 0 : index
    %6 = vector.load %arg4[%c0_5, %c0_6] : memref<32x128xbf16, #tpu.memory_space<vmem>>, vector<32x128xbf16>
    %cst_7 = arith.constant dense<0.000000e+00> : vector<16x128xf32>
    %7 = tpu.matmul %3, %6, %cst_7 {dimension_numbers = #tpu.dot_dimension_numbers<[1], [0], [0], [1], [0, 0, 1, 1], [], []>} : vector<16x32xbf16>, vector<32x128xbf16>, vector<16x128xf32> -> vector<16x128xf32>
    %8 = arith.addf %5, %7 : vector<16x128xf32>
    %c0_8 = arith.constant 0 : index
    %c0_9 = arith.constant 0 : index
    %9 = vector.load %arg7[%c0_8, %c0_9] : memref<4x128xf32, #tpu.memory_space<vmem>>, vector<1x128xf32>
    %10 = vector.broadcast %9 : vector<1x128xf32> to vector<16x128xf32>
    %11 = arith.addf %8, %10 : vector<16x128xf32>
    %cst_10 = arith.constant 0.000000e+00 : f32
    %12 = vector.broadcast %cst_10 : f32 to vector<16x128xf32>
    %13 = arith.maximumf %11, %12 : vector<16x128xf32>
    %14 = arith.truncf %13 : vector<16x128xf32> to vector<16x128xbf16>
    %c0_11 = arith.constant 0 : index
    %c0_12 = arith.constant 0 : index
    %15 = vector.load %arg5[%c0_11, %c0_12] : memref<128x128xbf16, #tpu.memory_space<vmem>>, vector<128x128xbf16>
    %cst_13 = arith.constant dense<0.000000e+00> : vector<16x128xf32>
    %16 = tpu.matmul %14, %15, %cst_13 {dimension_numbers = #tpu.dot_dimension_numbers<[1], [0], [0], [1], [0, 0, 1, 1], [], []>} : vector<16x128xbf16>, vector<128x128xbf16>, vector<16x128xf32> -> vector<16x128xf32>
    %c1 = arith.constant 1 : index
    %c0_14 = arith.constant 0 : index
    %17 = vector.load %arg7[%c1, %c0_14] : memref<4x128xf32, #tpu.memory_space<vmem>>, vector<1x128xf32>
    %18 = vector.broadcast %17 : vector<1x128xf32> to vector<16x128xf32>
    %19 = arith.addf %16, %18 : vector<16x128xf32>
    %20 = arith.truncf %19 : vector<16x128xf32> to vector<16x128xbf16>
    %c0_15 = arith.constant 0 : index
    %c0_16 = arith.constant 0 : index
    %21 = vector.load %arg6[%c0_15, %c0_16] : memref<128x128xbf16, #tpu.memory_space<vmem>>, vector<128x128xbf16>
    %cst_17 = arith.constant dense<0.000000e+00> : vector<16x128xf32>
    %22 = tpu.matmul %20, %21, %cst_17 {dimension_numbers = #tpu.dot_dimension_numbers<[1], [0], [0], [1], [0, 0, 1, 1], [], []>} : vector<16x128xbf16>, vector<128x128xbf16>, vector<16x128xf32> -> vector<16x128xf32>
    %c2 = arith.constant 2 : index
    %c0_18 = arith.constant 0 : index
    %23 = vector.load %arg7[%c2, %c0_18] : memref<4x128xf32, #tpu.memory_space<vmem>>, vector<1x128xf32>
    %24 = vector.broadcast %23 : vector<1x128xf32> to vector<16x128xf32>
    %25 = arith.addf %22, %24 : vector<16x128xf32>
    %cst_19 = arith.constant 0.000000e+00 : f32
    %26 = vector.broadcast %cst_19 : f32 to vector<16x128xf32>
    %27 = arith.maximumf %25, %26 : vector<16x128xf32>
    %c3 = arith.constant 3 : index
    %c0_20 = arith.constant 0 : index
    %28 = vector.load %arg7[%c3, %c0_20] : memref<4x128xf32, #tpu.memory_space<vmem>>, vector<1x128xf32>
    %29 = vector.broadcast %28 : vector<1x128xf32> to vector<16x128xf32>
    %30 = arith.mulf %27, %29 : vector<16x128xf32>
    %cst_21 = arith.constant dense<0.000000e+00> : vector<16xf32>
    %31 = vector.multi_reduction <add>, %30, %cst_21 [1] : vector<16x128xf32> to vector<16xf32>
    %c0_22 = arith.constant 0 : index
    %c0_23 = arith.constant 0 : index
    %32 = memref.load %arg8[%c0_22, %c0_23] : memref<1x1xf32, #tpu.memory_space<smem>>
    %33 = vector.broadcast %32 : f32 to vector<16xf32>
    %34 = arith.addf %31, %33 : vector<16xf32>
    %35 = vector.shape_cast %34 : vector<16xf32> to vector<1x1x16xf32>
    %c0_24 = arith.constant 0 : index
    %c0_25 = arith.constant 0 : index
    %c0_26 = arith.constant 0 : index
    %36 = vector.load %arg9[%c0_24, %c0_25, %c0_26] : memref<1x1x16xf32, #tpu.memory_space<vmem>>, vector<1x1x16xf32>
    tpu.vector_store %arg9[%c0_24, %c0_25, %c0_26], %35 {strides = array<i32>} : memref<1x1x16xf32, #tpu.memory_space<vmem>>, vector<1x1x16xf32>,
    return
  }
  func.func @transform_0(%arg0: i32) -> (i32, i32) {
    %c0_i32 = arith.constant 0 : i32
    %c0_i32_0 = arith.constant 0 : i32
    return %arg0, %c0_i32 : i32, i32
  }
  func.func @transform_1(%arg0: i32) -> (i32, i32) {
    %c0_i32 = arith.constant 0 : i32
    %c0_i32_0 = arith.constant 0 : i32
    return %arg0, %c0_i32 : i32, i32
  }
  func.func @transform_2(%arg0: i32) -> (i32, i32) {
    %c0_i32 = arith.constant 0 : i32
    %c0_i32_0 = arith.constant 0 : i32
    %c0_i32_1 = arith.constant 0 : i32
    return %c0_i32, %c0_i32_0 : i32, i32
  }
  func.func @transform_3(%arg0: i32) -> (i32, i32) {
    %c0_i32 = arith.constant 0 : i32
    %c0_i32_0 = arith.constant 0 : i32
    %c0_i32_1 = arith.constant 0 : i32
    return %c0_i32, %c0_i32_0 : i32, i32
  }
  func.func @transform_4(%arg0: i32) -> (i32, i32) {
    %c0_i32 = arith.constant 0 : i32
    %c0_i32_0 = arith.constant 0 : i32
    %c0_i32_1 = arith.constant 0 : i32
    return %c0_i32, %c0_i32_0 : i32, i32
  }
  func.func @transform_5(%arg0: i32) -> (i32, i32) {
    %c0_i32 = arith.constant 0 : i32
    %c0_i32_0 = arith.constant 0 : i32
    %c0_i32_1 = arith.constant 0 : i32
    return %c0_i32, %c0_i32_0 : i32, i32
  }
  func.func @transform_6(%arg0: i32) -> (i32, i32) {
    %c0_i32 = arith.constant 0 : i32
    %c0_i32_0 = arith.constant 0 : i32
    %c0_i32_1 = arith.constant 0 : i32
    return %c0_i32, %c0_i32_0 : i32, i32
  }
  func.func @transform_7(%arg0: i32) -> (i32, i32) {
    %c0_i32 = arith.constant 0 : i32
    %c0_i32_0 = arith.constant 0 : i32
    %c0_i32_1 = arith.constant 0 : i32
    return %c0_i32, %c0_i32_0 : i32, i32
  }
  func.func @transform_8(%arg0: i32) -> (i32, i32, i32) {
    %c0_i32 = arith.constant 0 : i32
    %c0_i32_0 = arith.constant 0 : i32
    %c0_i32_1 = arith.constant 0 : i32
    return %arg0, %c0_i32, %c0_i32_0 : i32, i32, i32
  }
}

</mosaic_0001>

<bundles_post_ra>
// kernel: tpu_custom_call.1
= control target key start
LH: loop header
LB: loop body
LE: loop exit
PB: predicated region body
PF: predicated region fallthrough
CT: control target
= control target key end

     0   :  { %s1913_s0 = inlined_call_operand.hbm [shape: f32[32,32], index: 0, kind: input, shape index: {}]   ;;  %s1914_s1 = inlined_call_operand.hbm [shape: f32[32,32], index: 1, kind: input, shape index: {}]   ;;  %s1915_s2 = inlined_call_operand.hbm [shape: bf16[32,128], index: 2, kind: input, shape index: {}]   ;;  %s1916_s3 = inlined_call_operand.hbm [shape: bf16[32,128], index: 3, kind: input, shape index: {}]   ;;  %s1917_s4 = inlined_call_operand.hbm [shape: bf16[128,128], index: 4, kind: input, shape index: {}]   ;;  %s1918_s5 = inlined_call_operand.hbm [shape: bf16[128,128], index: 5, kind: input, shape index: {}]   ;;  %s1919_s6 = inlined_call_operand.vmem [shape: f32[4,128], index: 6, kind: input, shape index: {}]   ;;  %s1920_s7 = inlined_call_operand.<no memory space> [shape: f32[1,1], index: 7, kind: input, shape index: {}]   ;;  %s1921_s8 = inlined_call_operand.hbm [shape: f32[2,1,16], index: 8, kind: output, shape index: {}]  }
   0x1   :  { %1926 = sst [smem:[#allocation22_spill]] %s1913_s0 }
   0x2   :  { %1927 = sst [smem:[#allocation23_spill]] %s1915_s2 }
   0x3   :  { %1928 = sst [smem:[#allocation24_spill]] %s1916_s3 }
   0x4   :  { %13 = sst [smem:[#allocation2]] %s1920_s7 }
   0x5   :  { %14 = vsyncpa [#allocation4], 0 }
   0x6   :  { %16 = vsyncpa [#allocation4 + $0x1], 0 }
   0x7   :  { %17 = vsyncpa [#allocation7], 0 }
   0x8   :  { %19 = vsyncpa [#allocation7 + $0x1], 0 }
   0x9   :  { %20 = vsyncpa [#allocation10], 0 }
   0xa   :  { %21 = vsyncpa [#allocation13], 0 }
   0xb   :  { %22 = vsyncpa [#allocation5], 0 }
   0xc   :  { %24 = vsyncpa [#allocation5 + $0x1], 0  ;;  %s1524_s29 = smov 0   ;;  %s1526_s30 = smov 0  }
   0xd   :  { %s1528_s9 = smov 0   ;;  %s1530_s10 = smov 0  }
   0xe LB: > { %s1545_s7 = sadd.s32 4294967295, %s1461_s10   ;;  %s958_s11 = sadd.s32 4294967294, %s1461_s10   ;;  %s1461_s10 = sphi %s1530_s10, %s1955_s10   ;;  %s1457_s9 = sphi %s1528_s9, %s1954_s9   ;;  %s1453_s30 = sphi %s1526_s30, %s1953_s30   ;;  %s1449_s29 = sphi %s1524_s29, %s1952_s29  }
   0xf   : > { %p50_p0 = scmp.ne.s32.totalorder %s1453_s30, %s1449_s29  ;;  %p1922_p1 = scmp.eq.s32.totalorder %s1545_s7, 0 }
  0x10   : > { %p232_p3 = scmp.eq.s32.totalorder %s958_s11, 1  ;;  %p959_p5 = scmp.ge.s32.totalorder %s1461_s10, 1 }
  0x11   : > { %p1554_p4 = por %p1922_p1, %p50_p0  ;;  %p239_p7 = scmp.lt.s32.totalorder %s1461_s10, 3 }
  0x12   : > { %p1559_p6 = por %p232_p3, %p50_p0  ;;  %s1463_s15 = smov [#allocation8]  }
  0x13   : > { %s1929_s12 = scalar_select %p1554_p4, 1, 0 }
  0x14   : > { %s1930_s13 = scalar_select %p1559_p6, 1, 0 }
  0x15   : > { %p1564_p8 = pnand %p959_p5, %p239_p7  ;;  %s251_s16 = sshll.u32 %s1463_s15, 4  ;;  %s1568_s16 = int_to_ptr.vmem [resolvable:$true] %s251_s16 }
  0x16   : > { %1931 = sst [smem:[#allocation21_spill]] %s1930_s13  ;;  %s1464_s18 = smov [#allocation9]  }
  0x17   : > { %s1932_s14 = scalar_select %p1564_p8, 1, 0 }
  0x18   : > { %p1111_p9 = pneg %p1564_p8  ;;  %s264_s19 = sshll.u32 %s1464_s18, 4  ;;  %s1579_s19 = int_to_ptr.vmem [resolvable:$true] %s264_s19 }
  0x19   : > { %s1465_s20 = smov [#allocation11]   ;;  %s1934_s2 = sld [smem:[#allocation23_spill]] }
  0x1a   : > { %p1575_p11 = pnand %p1111_p9, %p1922_p1  ;;  %s1581_s21 = sshll.u32 %s1465_s20, 4  ;;  %s278_s21 = int_to_ptr.vmem [resolvable:$true] %s1581_s21 }
  0x1c   : > { %p1591_p13 = pneg %p1575_p11 }
  0x1f   : > { %s1207_s24 = scalar_lea.hbm %s1934_s2, 256 }
  0x20   : > { %p1208_p12 = scmp.ne.s32.totalorder %s1934_s2, %s1207_s24  ;;  %p1214_p5 = scmp.lt.u32.totalorder %s1207_s24, %s1934_s2 }
  0x22   : > { %p1210_p0 = pnand %p1591_p13, %p1208_p12 }
  0x24   : > { %p1211_p3 = pneg %p1210_p0 }
  0x26   : > { %p1216_p7 = pnand %p1214_p5, %p1211_p3 }
  0x28   : > { %1219 = shalt.err (!%p1216_p7)
}
  0x29   : > { %s1220_s15 = scalar_lea.vmem %s1568_s16, 256  ;;  %p1228_p2 = scmp.lt.s32.totalorder %s1568_s16, %s1568_s16 }
  0x2a   : > { %p1221_p9 = scmp.ne.s32.totalorder %s1568_s16, %s1220_s15  ;;  %p1229_p6 = scmp.lt.s32.totalorder %s1220_s15, %s1220_s15 }
  0x2c   : > { %p1223_p10 = pnand %p1221_p9, %p1591_p13  ;;  %p1230_p12 = por %p1229_p6, %p1228_p2 }
  0x2e   : > { %p1224_p1 = pneg %p1223_p10 }
  0x30   : > { %p1231_p0 = pnand %p1230_p12, %p1224_p1 }
  0x32   : > { %1234 = shalt.err (!%p1231_p0)
}
  0x33   : > { %s1466_s18 = smov 64   ;;  %s1467_s20 = smov 4  }
  0x34   : > { %1114 = dma.hbm_to_vmem [thread:$0]  (!%p1575_p11), %s1934_s2, 256, %s1568_s16, [#allocation7], %s1466_s18, %s1466_s18, %s1467_s20  }
  0x35   : > { %s1936_s3 = sld [smem:[#allocation24_spill]] }
  0x3b   : > { %s1235_s26 = scalar_lea.hbm %s1936_s3, 256 }
  0x3c   : > { %p1236_p1 = scmp.ne.s32.totalorder %s1936_s3, %s1235_s26  ;;  %p1242_p10 = scmp.lt.u32.totalorder %s1235_s26, %s1936_s3 }
  0x3e   : > { %p1238_p2 = pnand %p1236_p1, %p1591_p13 }
  0x40   : > { %p1239_p6 = pneg %p1238_p2 }
  0x42   : > { %p1244_p3 = pnand %p1242_p10, %p1239_p6 }
  0x44   : > { %1247 = shalt.err (!%p1244_p3)
}
  0x45   : > { %s1248_s16 = scalar_lea.vmem %s1579_s19, 256  ;;  %p1256_p12 = scmp.lt.s32.totalorder %s1579_s19, %s1579_s19 }
  0x46   : > { %p1249_p5 = scmp.ne.s32.totalorder %s1579_s19, %s1248_s16  ;;  %p1257_p0 = scmp.lt.s32.totalorder %s1248_s16, %s1248_s16 }
  0x48   : > { %p1251_p7 = pnand %p1249_p5, %p1591_p13  ;;  %p1258_p1 = por %p1257_p0, %p1256_p12 }
  0x4a   : > { %p1252_p9 = pneg %p1251_p7 }
  0x4c   : > { %p1259_p2 = pnand %p1258_p1, %p1252_p9 }
  0x4e   : > { %1262 = shalt.err (!%p1259_p2)
}
  0x4f   : > { %1117 = dma.hbm_to_vmem [thread:$0]  (!%p1575_p11), %s1936_s3, 256, %s1579_s19, [#allocation10], %s1466_s18, %s1466_s18, %s1467_s20  }
  0x50   : > { %s1263_s25 = scalar_lea.hbm %s1917_s4, 1024 }
  0x51   : > { %p1264_p6 = scmp.ne.s32.totalorder %s1917_s4, %s1263_s25  ;;  %p1270_p5 = scmp.lt.u32.totalorder %s1263_s25, %s1917_s4 }
  0x53   : > { %p1266_p10 = pnand %p1264_p6, %p1591_p13 }
  0x55   : > { %p1267_p3 = pneg %p1266_p10 }
  0x57   : > { %p1272_p7 = pnand %p1270_p5, %p1267_p3 }
  0x59   : > { %1275 = shalt.err (!%p1272_p7)
}
  0x5a   : > { %s1276_s16 = scalar_lea.vmem %s278_s21, 1024  ;;  %p1284_p1 = scmp.lt.s32.totalorder %s278_s21, %s278_s21 }
  0x5b   : > { %p1277_p9 = scmp.ne.s32.totalorder %s278_s21, %s1276_s16  ;;  %p1285_p2 = scmp.lt.s32.totalorder %s1276_s16, %s1276_s16 }
  0x5d   : > { %p1279_p12 = pnand %p1277_p9, %p1591_p13  ;;  %p1286_p4 = por %p1285_p2, %p1284_p1 }
  0x5f   : > { %p1280_p0 = pneg %p1279_p12 }
  0x61   : > { %p1287_p8 = pnand %p1286_p4, %p1280_p0 }
  0x63   : > { %1290 = shalt.err (!%p1287_p8)
}
  0x64   : > { %1120 = dma.hbm_to_vmem [thread:$0]  (!%p1575_p11), %s1917_s4, 1024, %s278_s21, [#allocation10], %s1466_s18, %s1466_s18, %s1467_s20  }
  0x65   : > { %s1468_s22 = smov [#allocation12]   ;;  %s1291_s26 = scalar_lea.hbm %s1918_s5, 1024 }
  0x66   : > { %s290_s23 = sshll.u32 %s1468_s22, 4  ;;  %p1292_p4 = scmp.ne.s32.totalorder %s1918_s5, %s1291_s26  ;;  %s291_s23 = int_to_ptr.vmem [resolvable:$true] %s290_s23 }
  0x67   : > { %p1298_p10 = scmp.lt.u32.totalorder %s1291_s26, %s1918_s5 }
  0x68   : > { %p1294_p8 = pnand %p1292_p4, %p1591_p13 }
  0x6a   : > { %p1295_p6 = pneg %p1294_p8 }
  0x6c   : > { %p1300_p3 = pnand %p1298_p10, %p1295_p6 }
  0x6e   : > { %1303 = shalt.err (!%p1300_p3)
}
  0x6f   : > { %s1304_s21 = scalar_lea.vmem %s291_s23, 1024  ;;  %p1312_p12 = scmp.lt.s32.totalorder %s291_s23, %s291_s23 }
  0x70   : > { %p1305_p5 = scmp.ne.s32.totalorder %s291_s23, %s1304_s21  ;;  %p1313_p0 = scmp.lt.s32.totalorder %s1304_s21, %s1304_s21 }
  0x72   : > { %p1307_p7 = pnand %p1305_p5, %p1591_p13  ;;  %p1314_p1 = por %p1313_p0, %p1312_p12 }
  0x74   : > { %p1308_p9 = pneg %p1307_p7 }
  0x76   : > { %p1315_p2 = pnand %p1314_p1, %p1308_p9 }
  0x78   : > { %1318 = shalt.err (!%p1315_p2)
}
  0x79   : > { %1123 = dma.hbm_to_vmem [thread:$0]  (!%p1575_p11), %s1918_s5, 1024, %s291_s23, [#allocation13], %s1466_s18, %s1466_s18, %s1467_s20  }
  0x7a   : > { %s1685_s17 = sadd.s32 1, %s1461_s10   ;;  %s37_s27 = sadd.s32 1, %s1457_s9 }
  0x7b   : > { %s34_s22 = ssub.s32 %s1461_s10, %s1685_s17  ;;  %p44_p13 = scmp.ne.s32.totalorder %s1457_s9, %s1453_s30 }
  0x7c   : > { %p35_p4 = scmp.eq.s32.totalorder %s34_s22, 0  ;;  %p45_p8 = scmp.eq.s32.totalorder %s1461_s10, 0 }
  0x7d   : > { %p1937_p6 = scmp.eq.s32.totalorder %s1545_s7, 1  ;;  %p1139_p3 = scmp.lt.s32.totalorder %s1461_s10, 2 }
  0x7e   : > { %s1701_s25 = scalar_select %p35_p4, %s1457_s9, %s37_s27  }
  0x7f   : > { %p1695_p10 = por %p1937_p6, %p44_p13  ;;  %p46_p5 = por %p45_p8, %p44_p13 }
  0x80   : > { %s310_s26 = sand.u32 1, %s1457_s9   ;;  %s1007_s18 = sshll.u32 %s1461_s10, 8 }
  0x81   : > { %s1704_s28 = sshll.u32 %s310_s26, 4  ;;  %s1939_s0 = sld [smem:[#allocation22_spill]] }
  0x82   : > { %s314_s15 = scalar_lea.vmem [#allocation3], %s1704_s28  ;;  %p1717_p11 = pnand %p1139_p3, %p46_p5 }
  0x83   : > { %s321_s16 = sshll.u32 %s314_s15, 4  ;;  %s1721_s19 = scalar_lea.sflag [#allocation4], %s310_s26  ;;  %s1715_s16 = int_to_ptr.vmem [resolvable:$true] %s321_s16 }
  0x84   : > { %p1321_p9 = pneg %p1717_p11 }
  0x87   : > { %s1712_s11 = scalar_lea.hbm %s1939_s0, %s1007_s18  ;;  %s1324_s20 = scalar_lea.hbm %s1939_s0, 512 }
  0x88   : > { %s1319_s13 = scalar_lea.hbm %s1712_s11, 256  ;;  %p1325_p1 = scmp.lt.u32.totalorder %s1712_s11, %s1939_s0 }
  0x89   : > { %p1320_p7 = scmp.ne.s32.totalorder %s1712_s11, %s1319_s13  ;;  %p1326_p2 = scmp.lt.u32.totalorder %s1324_s20, %s1319_s13 }
  0x8a   : > { %p1328_p4 = scmp.lt.u32.totalorder %s1319_s13, %s1712_s11 }
  0x8b   : > { %p1322_p12 = pnand %p1321_p9, %p1320_p7  ;;  %p1327_p13 = por %p1326_p2, %p1325_p1 }
  0x8d   : > { %p1323_p0 = pneg %p1322_p12  ;;  %p1329_p8 = por %p1328_p4, %p1327_p13 }
  0x8f   : > { %p1330_p6 = pnand %p1329_p8, %p1323_p0 }
  0x91   : > { %1333 = shalt.err (!%p1330_p6)
}
  0x92   : > { %s1334_s26 = scalar_lea.vmem %s1715_s16, 256  ;;  %s1469_s27 = smov [#allocation3]  }
  0x93   : > { %p1335_p3 = scmp.ne.s32.totalorder %s1715_s16, %s1334_s26  ;;  %s1339_s22 = sshll.u32 %s1469_s27, 4  ;;  %s1340_s22 = int_to_ptr.vmem [resolvable:$false] %s1339_s22 }
  0x94   : > { %s1341_s23 = scalar_lea.vmem %s1340_s22, 512  ;;  %p1342_p12 = scmp.lt.s32.totalorder %s1715_s16, %s1340_s22 }
  0x95   : > { %p1337_p5 = pnand %p1335_p3, %p1321_p9  ;;  %p1343_p1 = scmp.lt.s32.totalorder %s1341_s23, %s1334_s26 }
  0x97   : > { %p1338_p7 = pneg %p1337_p5  ;;  %p1344_p2 = por %p1343_p1, %p1342_p12 }
  0x99   : > { %p1345_p13 = pnand %p1344_p2, %p1338_p7 }
  0x9b   : > { %1348 = shalt.err (!%p1345_p13)
}
  0x9c   : > { %s1470_s13 = smov 128   ;;  %s1471_s20 = smov 8  }
  0x9d   : > { %1127 = dma.hbm_to_vmem [thread:$0]  (!%p1717_p11), %s1712_s11, 256, %s1715_s16, %s1721_s19, %s1470_s13, %s1470_s13, %s1471_s20  }
  0x9e   : > { %s1757_s27 = scalar_lea.hbm %s1914_s1, %s1007_s18  ;;  %s335_s22 = scalar_lea.vmem [#allocation6], %s1704_s28 }
  0x9f   : > { %s342_s23 = sshll.u32 %s335_s22, 4  ;;  %s331_s0 = sand.u32 1, %s1461_s10   ;;  %s1760_s23 = int_to_ptr.vmem [resolvable:$true] %s342_s23 }
  0xa0   : > { %s1763_s2 = scalar_lea.sflag [#allocation7], %s331_s0  ;;  %s1349_s3 = scalar_lea.hbm %s1757_s27, 256 }
  0xa1   : > { %p1350_p0 = scmp.ne.s32.totalorder %s1757_s27, %s1349_s3  ;;  %s1354_s16 = scalar_lea.hbm %s1914_s1, 512 }
  0xa2   : > { %p1355_p6 = scmp.lt.u32.totalorder %s1757_s27, %s1914_s1  ;;  %p1356_p3 = scmp.lt.u32.totalorder %s1354_s16, %s1349_s3 }
  0xa3   : > { %p1352_p4 = pnand %p1350_p0, %p1321_p9  ;;  %p1358_p7 = scmp.lt.u32.totalorder %s1349_s3, %s1757_s27 }
  0xa4   : > { %p1357_p5 = por %p1356_p3, %p1355_p6 }
  0xa5   : > { %p1353_p8 = pneg %p1352_p4 }
  0xa6   : > { %p1359_p12 = por %p1358_p7, %p1357_p5 }
  0xa8   : > { %p1360_p1 = pnand %p1359_p12, %p1353_p8 }
  0xaa   : > { %1363 = shalt.err (!%p1360_p1)
}
  0xab   : > { %s1364_s0 = scalar_lea.vmem %s1760_s23, 256  ;;  %s1472_s28 = smov [#allocation6]  }
  0xac   : > { %p1365_p2 = scmp.ne.s32.totalorder %s1760_s23, %s1364_s0  ;;  %s1369_s26 = sshll.u32 %s1472_s28, 4  ;;  %s1370_s26 = int_to_ptr.vmem [resolvable:$false] %s1369_s26 }
  0xad   : > { %s1371_s22 = scalar_lea.vmem %s1370_s26, 512  ;;  %p1372_p4 = scmp.lt.s32.totalorder %s1760_s23, %s1370_s26 }
  0xae   : > { %p1367_p13 = pnand %p1365_p2, %p1321_p9  ;;  %p1373_p6 = scmp.lt.s32.totalorder %s1371_s22, %s1364_s0 }
  0xb0   : > { %p1368_p0 = pneg %p1367_p13  ;;  %p1374_p3 = por %p1373_p6, %p1372_p4 }
  0xb2   : > { %p1375_p5 = pnand %p1374_p3, %p1368_p0 }
  0xb4   : > { %1378 = shalt.err (!%p1375_p5)
}
  0xb5   : > { %1130 = dma.hbm_to_vmem [thread:$0]  (!%p1717_p11), %s1757_s27, 256, %s1760_s23, %s1763_s2, %s1470_s13, %s1470_s13, %s1471_s20  }
  0xb6   : > { %p1941_p9 = scmp.ne.s32.totalorder %s1932_s14, 0 }
  0xb7   : > { %s1795_s3 = sand.u32 (!%p1941_p9), 1, %s1453_s30   ;;  %p1942_p8 = scmp.ne.s32.totalorder (!%p1941_p9), %s1929_s12, 0 }
  0xb8   : > { %354 = sbr.rel (%p1941_p9) target bundleno = 1038 (0x40e), region = 52  ;;  %s972_s11 = sshll.u32 (!%p1941_p9), %s1795_s3, 4 }
  0xb9   : > { %s357_s18 = scalar_lea.sflag (!%p1941_p9), [#allocation4], %s1795_s3  ;;  %s1799_s16 = scalar_lea.vmem (!%p1941_p9), [#allocation3], %s972_s11 }
  0xbf   : > { %1424 = dma.done.wait (%p1942_p8), %s357_s18, 256  }
  0xc0   : > { %1426 = vsyncadd (%p1942_p8), %s357_s18, 4294967040  ;;  %s365_s2 = sand.u32 1, %s1545_s7   ;;  %s369_s21 = scalar_lea.vmem [#allocation6], %s972_s11 }
  0xc1   : > { %s366_s14 = scalar_lea.sflag [#allocation7], %s365_s2 }
  0xc2   : > { %1428 = dma.done.wait (%p1942_p8), %s366_s14, 256  }
  0xc3   : > { %1430 = vsyncadd (%p1942_p8), %s366_s14, 4294967040  ;;  %p1943_p11 = scmp.eq.s32.totalorder %s1545_s7, 0 }
  0xc5   : > { %1432 = dma.done.wait (%p1943_p11), [#allocation7], 256   ;;  %p1944_p7 = pmov %p1943_p11 }
  0xc7   : > { %1434 = vsyncadd (%p1944_p7), [#allocation7], 4294967040  ;;  %p1945_p12 = pmov %p1944_p7 }
  0xc8   : > { %p1946_p1 = pmov %p1944_p7 }
  0xc9   : > { %1436 = dma.done.wait (%p1945_p12), [#allocation10], 1280  }
  0xca   : > { %1438 = vsyncadd (%p1946_p1), [#allocation10], 4294966016  ;;  %p1947_p2 = pmov %p1946_p1 }
  0xcb   : > { %p1948_p13 = pmov %p1946_p1 }
  0xcc   : > { %1440 = dma.done.wait (%p1947_p2), [#allocation13], 1024  }
  0xcd   : > { %1442 = vsyncadd (%p1948_p13), [#allocation13], 4294966272  ;;  %v1473_v0 = vmov 0.0   ;;  %vm1474_vm0 = vmmov 0   ;;  %v1187_v1 = vld [vmem:[#allocation9] sm:$0xff]   ;;  %v1188_v2 = vld [vmem:[#allocation8] sm:$0xff]   ;;  %v802_v63 = vlaneseq }
  0xce   : > { %1033 = vmatprep.subr.bf16.mxu0 %v1473_v0  ;;  %1041 = vmatprep.subr.bf16.mxu1 %v1473_v0  ;;  %v1189_v3 = vld [vmem:[#allocation9 + $0x8] sm:$0xff]   ;;  %v1190_v4 = vld [vmem:[#allocation8 + $0x8] sm:$0xff]   ;;  %v428_v5 = vld [vmem:[%s369_s21] sm:$0xff]  ;;  %vm451_vm1 = vcmask 261120   ;;  %s796_s28 = sld [smem:[#allocation2]]  ;;  %s1004_s26 = sshll.u32 %s1545_s7, 4 }
  0xcf   : > { %1037 = vmatprep.mubr.msk.bf16.mxu0 %vm1474_vm0, %v1473_v0  ;;  %1045 = vmatprep.mubr.msk.bf16.mxu1 %vm1474_vm0, %v1473_v0  ;;  %v429_v6 = vld [vmem:[%s369_s21 + $0x8] sm:$0xff]  ;;  %v425_v7 = vld [vmem:[%s1799_s16] sm:$0xff]  ;;  %s421_s22 = scalar_lea.vmem [#allocation14], %s1795_s3  ;;  %vm813_vm2 = vcmask 130112   ;;  %vm816_vm3 = vcmask 122880   ;;  %s1869_s2 = scalar_lea.hbm %s1921_s8, %s1004_s26 }
  0xd0   : > { %1034 = vmatpush3.bf16.msra.mxu0 %v1187_v1  ;;  %1042 = vmatpush3.bf16.msra.mxu1 %v1188_v2  ;;  %v430_v8 = vpack.c.bf16 %v429_v6, %v428_v5  ;;  %v426_v9 = vld [vmem:[%s1799_s16 + $0x8] sm:$0xff]  ;;  %v1191_v11 = vld [vmem:[#allocation11] sm:$0xff]   ;;  %v1193_v13 = vld [vmem:[#allocation11 + $0x10] sm:$0xff]   ;;  %v805_v1 = vshrl.u32 %v802_v63, 7  ;;  %s831_s11 = sshll.u32 %s421_s22, 4  ;;  %s819_s14 = scalar_lea.sflag [#allocation5], %s1795_s3  ;;  %s1871_s11 = int_to_ptr.vmem [resolvable:$true] %s831_s11 }
  0xd1   : > { %1035 = vmatprep.subr.bf16.mxu0 %v1473_v0  ;;  %1043 = vmatprep.subr.bf16.mxu1 %v1473_v0  ;;  %v427_v10 = vpack.c.bf16 %v426_v9, %v425_v7  ;;  %v1192_v12 = vld [vmem:[#allocation11 + $0x8] sm:$0xff]   ;;  %v1194_v14 = vld [vmem:[#allocation11 + $0x18] sm:$0xff]   ;;  %v1195_v15 = vld [vmem:[#allocation11 + $0x20] sm:$0xff]   ;;  %s1379_s7 = scalar_lea.vmem %s1871_s11, 16  ;;  %s1475_s21 = smov [#allocation14]  }
  0xd2   : > { %v1196_v16 = vld [vmem:[#allocation11 + $0x28] sm:$0xff]   ;;  %v1197_v17 = vld [vmem:[#allocation11 + $0x30] sm:$0xff]   ;;  %v1198_v18 = vld [vmem:[#allocation11 + $0x38] sm:$0xff]   ;;  %p1380_p0 = scmp.ne.s32.totalorder %s1871_s11, %s1379_s7  ;;  %s1383_s12 = sshll.u32 %s1475_s21, 4  ;;  %s1384_s12 = int_to_ptr.vmem [resolvable:$false] %s1383_s12 }
  0xd3   : > { %v1199_v19 = vld [vmem:[#allocation12] sm:$0xff]   ;;  %v1200_v20 = vld [vmem:[#allocation12 + $0x8] sm:$0xff]   ;;  %v1201_v21 = vld [vmem:[#allocation12 + $0x10] sm:$0xff]   ;;  %s1385_s13 = scalar_lea.vmem %s1384_s12, 32  ;;  %p1386_p3 = scmp.lt.s32.totalorder %s1871_s11, %s1384_s12 }
  0xd4   : > { %1036 = vmatpush3.bf16.msra.mxu0 %v1189_v3  ;;  %1044 = vmatpush3.bf16.msra.mxu1 %v1190_v4  ;;  %v1202_v22 = vld [vmem:[#allocation12 + $0x18] sm:$0xff]   ;;  %v1203_v23 = vld [vmem:[#allocation12 + $0x20] sm:$0xff]   ;;  %v1204_v24 = vld [vmem:[#allocation12 + $0x28] sm:$0xff]   ;;  %v797_v3 = vstv %s796_s28  ;;  %p1381_p4 = pnand %p1380_p0, %p1695_p10  ;;  %p1387_p5 = scmp.lt.s32.totalorder %s1385_s13, %s1379_s7 }
  0xd5   : > { %1049 = vmatprep.subr.bf16.mxu0 %v1473_v0  ;;  %1069 = vmatprep.subr.bf16.mxu1 %v1473_v0  ;;  %v984_v27 = vld [vmem:[%s1919_s6] ss:$0 sm:$0xff]  ;;  %v1205_v41 = vld [vmem:[#allocation12 + $0x30] sm:$0xff]   ;;  %v1206_v42 = vld [vmem:[#allocation12 + $0x38] sm:$0xff]  }
  0xd6   : > { %v985_v43 = vld [vmem:[%s1919_s6 + $0x1] ss:$0 sm:$0xff]  ;;  %v994_v51 = vld [vmem:[%s1919_s6 + $0x2] ss:$0 sm:$0xff]  ;;  %v1003_v56 = vld [vmem:[%s1919_s6 + $0x3] ss:$0 sm:$0xff]  ;;  %p1382_p6 = pneg %p1381_p4  ;;  %p1388_p9 = por %p1387_p5, %p1386_p3 }
  0xd7   : > { %1038 = vmatmul.mubr.msk.bf16.vlgmr.msra.gmra.mrb[0].mxu0 %vm451_vm1, %v430_v8  ;;  %1046 = vmatmul.mubr.msk.bf16.vlgmr.msra.gmra.mrb[0].mxu1 %vm451_vm1, %v427_v10 }
  0xd8   : > { %1050 = vmatpush3.bf16.msra.mxu0 %v1191_v11  ;;  %1065 = vmatprep.mubr.msk.bf16.mxu0 %vm1474_vm0, %v1473_v0  ;;  %p1389_p8 = pnand %p1388_p9, %p1382_p6 }
  0xd9   : > { %1051 = vmatprep.subr.bf16.mxu0 %v1473_v0  ;;  %1085 = vmatprep.mubr.msk.bf16.mxu1 %vm1474_vm0, %v1473_v0 }
  0xda   : > { %1070 = vmatpush3.bf16.msra.mxu1 %v1199_v19 }
  0xdb   : > { %1071 = vmatprep.subr.bf16.mxu1 %v1473_v0 }
  0xdc   : > { %1052 = vmatpush3.bf16.msra.mxu0 %v1192_v12 }
  0xdd   : > { %1053 = vmatprep.subr.bf16.mxu0 %v1473_v0 }
  0xde   : > { %1072 = vmatpush3.bf16.msra.mxu1 %v1200_v20 }
  0xdf   : > { %1073 = vmatprep.subr.bf16.mxu1 %v1473_v0 }
  0xe0   : > { %1054 = vmatpush3.bf16.msra.mxu0 %v1193_v13 }
  0xe1   : > { %1055 = vmatprep.subr.bf16.mxu0 %v1473_v0 }
  0xe2   : > { %1074 = vmatpush3.bf16.msra.mxu1 %v1201_v21 }
  0xe3   : > { %1075 = vmatprep.subr.bf16.mxu1 %v1473_v0 }
  0xe4   : > { %1056 = vmatpush3.bf16.msra.mxu0 %v1194_v14 }
  0xe5   : > { %1057 = vmatprep.subr.bf16.mxu0 %v1473_v0 }
  0xe6   : > { %1076 = vmatpush3.bf16.msra.mxu1 %v1202_v22 }
  0xe7   : > { %1077 = vmatprep.subr.bf16.mxu1 %v1473_v0 }
  0xe8   : > { %1058 = vmatpush3.bf16.msra.mxu0 %v1195_v15 }
  0xe9   : > { %1059 = vmatprep.subr.bf16.mxu0 %v1473_v0 }
  0xea   : > { %1078 = vmatpush3.bf16.msra.mxu1 %v1203_v23 }
  0xeb   : > { %1079 = vmatprep.subr.bf16.mxu1 %v1473_v0 }
  0xec   : > { %1060 = vmatpush3.bf16.msra.mxu0 %v1196_v16 }
  0xed   : > { %1061 = vmatprep.subr.bf16.mxu0 %v1473_v0 }
  0xee   : > { %1080 = vmatpush3.bf16.msra.mxu1 %v1204_v24 }
  0xef   : > { %1081 = vmatprep.subr.bf16.mxu1 %v1473_v0 }
  0xf0   : > { %1062 = vmatpush3.bf16.msra.mxu0 %v1197_v17 }
  0xf1   : > { %1063 = vmatprep.subr.bf16.mxu0 %v1473_v0 }
  0xf2   : > { %1082 = vmatpush3.bf16.msra.mxu1 %v1205_v41 }
  0xf3   : > { %1083 = vmatprep.subr.bf16.mxu1 %v1473_v0  ;;  %v803_v0 = vand.u32 127, %v802_v63 }
  0xf4   : > { %1064 = vmatpush3.bf16.msra.mxu0 %v1198_v18 }
  0xf5   : > { %v808_v2 = vadd.s32 4294967288, %v803_v0  ;;  %v806_v5 = vsub.s32 %v803_v0, %v805_v1 }
  0xf6   : > { %1084 = vmatpush3.bf16.msra.mxu1 %v1206_v42 }
  0xf7   : > { %v811_v7 = vsub.s32 %v808_v2, %v805_v1 }
 0x1aa   : > { %v489_v25 = vpop.f32.mrb[0].mxu0  ;;  %v545_v26 = vpop.f32.mrb[0].mxu1 }
 0x1ab   : > { %v1039_v28 = vpop.f32.mrb[1].mxu0  ;;  %v546_v29 = vadd.f32 %v545_v26, %v489_v25  ;;  %v1047_v30 = vpop.f32.mrb[1].mxu1 }
 0x1ac   : > { %v492_v31 = vpop.f32.mrb[2].mxu0  ;;  %v548_v32 = vpop.f32.mrb[2].mxu1 }
 0x1ad   : > { %v1040_v33 = vpop.f32.mrb[3].mxu0  ;;  %v557_v34 = vadd.f32 %v984_v27, %v546_v29  ;;  %v549_v35 = vadd.f32 %v548_v32, %v492_v31  ;;  %v1048_v36 = vpop.f32.mrb[3].mxu1 }
 0x1af   : > { %v558_v37 = vadd.f32 %v984_v27, %v549_v35  ;;  %v559_v38 = vmax.f32 %v557_v34, 0.0 }
 0x1b1   : > { %v560_v39 = vmax.f32 %v558_v37, 0.0 }
 0x1b3   : > { %v561_v40 = vpack.c.bf16 %v560_v39, %v559_v38 }
 0x1b5   : > { %1066 = vmatmul.mubr.bf16.vlgmr.msra.gmra.mrb[4].mxu0 %v561_v40 }
 0x288   : > { %v665_v44 = vpop.f32.mrb[4].mxu0 }
 0x289   : > { %v1067_v45 = vpop.f32.mrb[5].mxu0  ;;  %v666_v47 = vadd.f32 %v985_v43, %v665_v44 }
 0x28a   : > { %v668_v46 = vpop.f32.mrb[6].mxu0 }
 0x28b   : > { %v669_v48 = vadd.f32 %v985_v43, %v668_v46  ;;  %v1068_v49 = vpop.f32.mrb[7].mxu0 }
 0x28d   : > { %v672_v50 = vpack.c.bf16 %v669_v48, %v666_v47 }
 0x28f   : > { %1086 = vmatmul.mubr.bf16.vlgmr.msra.gmra.mrb[4].mxu1 %v672_v50 }
 0x362   : > { %v776_v52 = vpop.f32.mrb[4].mxu1 }
 0x363   : > { %v777_v53 = vadd.f32 %v994_v51, %v776_v52  ;;  %v1087_v54 = vpop.f32.mrb[5].mxu1 }
 0x364   : > { %v779_v55 = vpop.f32.mrb[6].mxu1 }
 0x365   : > { %v783_v57 = vmax.f32 %v777_v53, 0.0  ;;  %v780_v58 = vadd.f32 %v994_v51, %v779_v55  ;;  %v1088_v59 = vpop.f32.mrb[7].mxu1 }
 0x367   : > { %v784_v60 = vmax.f32 %v780_v58, 0.0  ;;  %v790_v61 = vmul.f32 %v1003_v56, %v783_v57 }
 0x369   : > { %792 = vadd.xlane.f32.xlu0 %v790_v61  ;;  %v791_v62 = vmul.f32 %v1003_v56, %v784_v60 }
 0x36d   : > { %794 = vadd.xlane.f32.xlu0 %v791_v62 }
 0x3f6   : > { %v793_v4 = vpop.xlane.xlu0 %792 }
 0x3f7   : > { %v798_v6 = vadd.f32 %v797_v3, %v793_v4 }
 0x3f9   : > { %v807_v10 = vrot.slane %v798_v6, %v806_v5 }
 0x3fa   : > { %v795_v8 = vpop.xlane.xlu0 %794 }
 0x3fb   : > { %v799_v9 = vadd.f32 %v797_v3, %v795_v8 }
 0x3fd   : > { %v812_v11 = vrot.slane %v799_v9, %v811_v7 }
 0x3ff   : > { %v814_v12 = vsel %vm813_vm2, %v812_v11, %v807_v10 }
 0x400   : > { %817 = vst.msk [vmem:[%s421_s22] sm:$0x1] %vm816_vm3, %v814_v12 }
 0x401   : > { %1392 = shalt.err (!%p1389_p8)
}
 0x402   : > { %s1393_s3 = scalar_lea.hbm %s1869_s2, 16  ;;  %s1397_s23 = scalar_lea.hbm %s1921_s8, 32 }
 0x403   : > { %p1394_p11 = scmp.ne.s32.totalorder %s1869_s2, %s1393_s3  ;;  %p1398_p1 = scmp.lt.u32.totalorder %s1869_s2, %s1921_s8 }
 0x404   : > { %p1399_p2 = scmp.lt.u32.totalorder %s1397_s23, %s1393_s3  ;;  %p1401_p0 = scmp.lt.u32.totalorder %s1393_s3, %s1869_s2 }
 0x405   : > { %p1395_p7 = pnand %p1394_p11, %p1695_p10 }
 0x406   : > { %p1400_p13 = por %p1399_p2, %p1398_p1 }
 0x407   : > { %p1396_p12 = pneg %p1395_p7 }
 0x408   : > { %p1402_p4 = por %p1401_p0, %p1400_p13 }
 0x40a   : > { %p1403_p6 = pnand %p1402_p4, %p1396_p12 }
 0x40c   : > { %1406 = shalt.err (!%p1403_p6)
}
 0x40d   : > { %1109 = dma.vmem_to_hbm [thread:$0]  (%p1695_p10), %s1871_s11, 16, %s1869_s2, %s819_s14  }
 0x40e PF: > { %s1949_s0 = sld [smem:[#allocation21_spill]]  ;;  %s843_s28 = sand.u32 1, %s1449_s29  }
 0x40f   : > { %p1951_p5 = scmp.ge.s32.totalorder %s1461_s10, 2  ;;  %s844_s26 = scalar_lea.sflag [#allocation5], %s843_s28 }
 0x414   : > { %p1950_p3 = scmp.ne.s32.totalorder %s1949_s0, 0 }
 0x416   : > { %p1132_p9 = pnand %p1951_p5, %p1950_p3 }
 0x418   : > { %1444 = dma.done.wait (!%p1132_p9), %s844_s26, 16  }
 0x419   : > { %1446 = vsyncadd (!%p1132_p9), %s844_s26, 4294967280  ;;  %p27_p8 = scmp.ge.s32.totalorder %s1685_s17, 4   ;;  %s1952_s29 = smov %s1453_s30 }
 0x41a   : > { %s1953_s30 = smov %s1457_s9  ;;  %s1954_s9 = smov %s1701_s25 }
 0x41b   : > { %s1955_s10 = smov %s1685_s17  ;;  %29 = sbr.rel (!%p27_p8) target bundleno = 14 (0xe), region = 126 }
 0x422   :  { %848 = vsyncpa [#allocation4], 1 }
 0x423   :  { %850 = vsyncpa [#allocation4 + $0x1], 1 }
 0x424   :  { %851 = vsyncpa [#allocation7], 1 }
 0x425   :  { %853 = vsyncpa [#allocation7 + $0x1], 1 }
 0x426   :  { %854 = vsyncpa [#allocation10], 1 }
 0x427   :  { %855 = vsyncpa [#allocation13], 1 }
 0x428   :  { %856 = vsyncpa [#allocation5], 1 }
 0x429   :  { %858 = vsyncpa [#allocation5 + $0x1], 1 }

</bundles_post_ra>
